<compile_context>
chip_gen: v6e
topology: v6e:2x2x1
jax: 0.10.0
libtpu: 0.0.40
codegen_flags: <defaults>
</compile_context>

<pallas_src>
import jax
import jax.numpy as jnp
from jax import lax
from jax.experimental import pallas as pl
from jax.experimental.pallas import tpu as pltpu


SUB = 128  # columns of the batch tile kept live in vregs per inner iteration


def policy_kernel(x_ref, w1_ref, b1_ref, w2_ref, b2_ref, w3_ref, b3_ref, o_ref):
    """Transposed MLP tile: batch on the lane axis.

    x_ref : (4,   TILE_B)  streamed observation tile (features x batch), f32
    w1_ref: (128, 4)  f32   b1_ref: (128, 1) f32
    w2_ref: (64, 128) bf16  b2_ref: (64, 1)  f32
    w3_ref: (2,  64)  f32   b3_ref: (2, 1)   f32
    o_ref : (2,   TILE_B)  softmax probabilities, f32
    """
    # Hoist the resident parameters out of the sub-chunk loop.
    w1 = w1_ref[...]                                   # (128, 4)
    b1 = b1_ref[...]                                   # (128, 1)
    w2 = w2_ref[...]                                   # (64, 128) bf16
    b2 = b2_ref[...]                                   # (64, 1)
    # Only the logit *difference* matters for a 2-class softmax.
    w3d = w3_ref[1:2, :] - w3_ref[0:1, :]              # (1, 64)
    b3d = b3_ref[1:2, :] - b3_ref[0:1, :]              # (1, 1)

    tile_b = x_ref.shape[1]
    n_sub = tile_b // SUB                              # static python int

    def body(c, carry):
        off = pl.multiple_of(c * SUB, SUB)
        xc = x_ref[:, pl.ds(off, SUB)]                 # (4, SUB) f32

        # fc1 on the VPU: K=4 is far too small to be worth a padded MXU push.
        h1 = w1[:, 0:1] * xc[0:1, :]                   # (128,1)*(1,SUB)->(128,SUB)
        for k in range(1, 4):
            h1 = h1 + w1[:, k:k + 1] * xc[k:k + 1, :]
        h1 = jnp.maximum(h1 + b1, 0.0)                 # (128, SUB) f32

        # fc2 on the MXU: bf16 operands, f32 accumulation.
        h2 = jnp.dot(w2, h1.astype(jnp.bfloat16),
                     preferred_element_type=jnp.float32) + b2
        h2 = jnp.maximum(h2, 0.0)                      # (64, SUB) f32

        # fc3 logit difference (tiny, f32) + exact 2-class softmax via sigmoid.
        d = jnp.dot(w3d, h2, preferred_element_type=jnp.float32) + b3d  # (1, SUB)
        p1 = 1.0 / (1.0 + jnp.exp(-d))                 # exact reciprocal
        p0 = 1.0 - p1
        probs = jnp.concatenate([p0, p1], axis=0)      # (2, SUB)
        o_ref[:, pl.ds(off, SUB)] = probs.astype(o_ref.dtype)
        return carry

    # Modest unroll so the LLO scheduler can interleave VPU(fc1) with MXU(fc2)
    # across independent iterations without exploding code size.
    unroll = 1
    for u in (8, 4, 2):
        if n_sub % u == 0:
            unroll = u
            break
    lax.fori_loop(0, n_sub, body, 0, unroll=unroll)


def _round_up(n, m):
    return m * pl.cdiv(n, m)


def _tpu_vmem_bytes():
    try:
        return int(pltpu.get_tpu_info().vmem_capacity_bytes)
    except Exception:
        return 64 * 1024 * 1024  # conservative (v7x-sized) fallback


def _pick_tiling(batch):
    """Generation-aware batch tile size and scoped-VMEM limit."""
    vmem = _tpu_vmem_bytes()
    if vmem >= 100 * 1024 * 1024:
        # v5e / v6e: 128 MiB VMEM, single TensorCore -> one big tile is fine.
        cap, vmem_limit, min_tiles = 32768, 64 * 1024 * 1024, 1
    else:
        # v7x (64 MiB VMEM, 2 TCs) or unknown: smaller cap, force >=2 tiles so
        # the ("parallel",) grid axis can be megacore-sharded.
        cap, vmem_limit, min_tiles = 16384, 32 * 1024 * 1024, 2
    tile_b = min(cap, _round_up(pl.cdiv(batch, min_tiles), SUB))
    return max(tile_b, SUB), vmem_limit


def policy_forward_t(x_t, w1, b1, w2, b2, w3, b3, *, tile_b=None):
    """Transposed entry point: x_t (4, B) f32 -> probabilities (2, B) f32."""
    _, B = x_t.shape
    auto_tile, vmem_limit = _pick_tiling(B)
    if tile_b is None:
        tile_b = auto_tile
    tile_b = _round_up(min(tile_b, _round_up(B, SUB)), SUB)
    b_pad = _round_up(B, tile_b)
    x_p = x_t if b_pad == B else jnp.pad(x_t, ((0, 0), (0, b_pad - B)))
    w2_bf = w2.astype(jnp.bfloat16)  # cast once; halves the resident-weight DMA
    grid = (b_pad // tile_b,)

    def resident(arr):
        # Full-array block, constant block index -> DMA'd once, never refetched.
        return pl.BlockSpec(arr.shape, lambda i: (0, 0))

    out_t = pl.pallas_call(
        policy_kernel,
        out_shape=jax.ShapeDtypeStruct((2, b_pad), jnp.float32),
        grid_spec=pltpu.PrefetchScalarGridSpec(
            num_scalar_prefetch=0,
            grid=grid,
            in_specs=[
                pl.BlockSpec((4, tile_b), lambda i: (0, i)),   # streamed x tile
                resident(w1), resident(b1),
                resident(w2_bf), resident(b2),
                resident(w3), resident(b3),
            ],
            out_specs=pl.BlockSpec((2, tile_b), lambda i: (0, i)),
        ),
        compiler_params=pltpu.CompilerParams(
            dimension_semantics=("parallel",),   # megacore-shard batch tiles
            vmem_limit_bytes=vmem_limit,
        ),
    )(x_p, w1, b1, w2_bf, b2, w3, b3)

    return out_t[:, :B]


def policy_forward(x, w1, b1, w2, b2, w3, b3, *, tile_b=None):
    """PyTorch-layout wrapper: x (B, 4) f32 -> probabilities (B, 2) f32.

    Note: the two .T below are HBM transpose passes; for RL rollout loops keep
    the state in (4, B) layout end-to-end and call policy_forward_t directly.
    """
    return policy_forward_t(x.T, w1, b1, w2, b2, w3, b3, tile_b=tile_b).T


def init_params(key):
    """Deterministic init mimicking PyTorch nn.Linear default (U[-1/sqrt(fan_in), +])."""
    def linear(key, fan_in, fan_out):
        kw, kb = jax.random.split(key)
        bound = 1.0 / jnp.sqrt(fan_in)
        w = jax.random.uniform(kw, (fan_out, fan_in), jnp.float32, -bound, bound)
        b = jax.random.uniform(kb, (fan_out, 1), jnp.float32, -bound, bound)
        return w, b

    k1, k2, k3 = jax.random.split(key, 3)
    w1, b1 = linear(k1, 4, 128)
    w2, b2 = linear(k2, 128, 64)
    w3, b3 = linear(k3, 64, 2)
    return w1, b1, w2, b2, w3, b3


def reference_forward(x, w1, b1, w2, b2, w3, b3):
    h1 = jnp.maximum(x @ w1.T + b1.T, 0.0)
    h2 = jnp.maximum(h1 @ w2.T + b2.T, 0.0)
    logits = h2 @ w3.T + b3.T
    return jax.nn.softmax(logits, axis=1)


if __name__ == "__main__":
    key = jax.random.PRNGKey(0)
    k_params, k_x1, k_x2 = jax.random.split(key, 3)
    params = init_params(k_params)

    # Small batch of CartPole-like 4-dim observations (typical RL use case).
    x = jax.random.normal(k_x1, (8, 4), jnp.float32)
    probs = jax.block_until_ready(policy_forward(x, *params))
    ref = reference_forward(x, *params)
    assert probs.shape == (8, 2)
    assert jnp.allclose(jnp.sum(probs, axis=1), 1.0, atol=1e-5)
    # bf16 fc2 operands (f32 accumulation) perturb probabilities at ~1e-4 level.
    assert jnp.allclose(probs, ref, atol=2e-3, rtol=2e-3)

    # Second check: non-multiple batch with a multi-tile grid (exercises the
    # padded last tile + pipelined streaming path and the sub-chunk loop).
    x2 = jax.random.normal(k_x2, (200, 4), jnp.float32)
    probs2 = jax.block_until_ready(policy_forward(x2, *params, tile_b=128))
    ref2 = reference_forward(x2, *params)
    assert probs2.shape == (200, 2)
    assert jnp.allclose(jnp.sum(probs2, axis=1), 1.0, atol=1e-5)
    assert jnp.allclose(probs2, ref2, atol=2e-3, rtol=2e-3)

    print("KERNEL_OK")
</pallas_src>

<mosaic_0001>
module attributes {stable_mosaic.version = 11 : i64} {
  func.func @policy_kernel(%arg0: i32, %arg1: memref<4x128xf32, #tpu.memory_space<vmem>>, %arg2: memref<128x4xf32, #tpu.memory_space<vmem>>, %arg3: memref<128x1xf32, #tpu.memory_space<vmem>>, %arg4: memref<64x128xbf16, #tpu.memory_space<vmem>>, %arg5: memref<64x1xf32, #tpu.memory_space<vmem>>, %arg6: memref<2x64xf32, #tpu.memory_space<vmem>>, %arg7: memref<2x1xf32, #tpu.memory_space<vmem>>, %arg8: memref<2x128xf32, #tpu.memory_space<vmem>>) attributes {dimension_semantics = [#tpu.dimension_semantics<parallel>], iteration_bounds = array<i64: 1>, scalar_prefetch = 0 : i64, scratch_operands = 0 : i64, tpu.core_type = #tpu.core_type<tc>, window_params = [{transform_indices = @transform_0, window_bounds = array<i64: 4, 128>}, {pipeline_mode = #tpu.pipeline_mode<synchronous>, transform_indices = @transform_1, window_bounds = array<i64: 128, 4>}, {pipeline_mode = #tpu.pipeline_mode<synchronous>, transform_indices = @transform_2, window_bounds = array<i64: 128, 1>}, {pipeline_mode = #tpu.pipeline_mode<synchronous>, transform_indices = @transform_3, window_bounds = array<i64: 64, 128>}, {pipeline_mode = #tpu.pipeline_mode<synchronous>, transform_indices = @transform_4, window_bounds = array<i64: 64, 1>}, {pipeline_mode = #tpu.pipeline_mode<synchronous>, transform_indices = @transform_5, window_bounds = array<i64: 2, 64>}, {pipeline_mode = #tpu.pipeline_mode<synchronous>, transform_indices = @transform_6, window_bounds = array<i64: 2, 1>}, {transform_indices = @transform_7, window_bounds = array<i64: 2, 128>}]} {
    %c0 = arith.constant 0 : index
    %c0_0 = arith.constant 0 : index
    %0 = vector.load %arg2[%c0, %c0_0] : memref<128x4xf32, #tpu.memory_space<vmem>>, vector<128x4xf32>
    %c0_1 = arith.constant 0 : index
    %c0_2 = arith.constant 0 : index
    %1 = vector.load %arg3[%c0_1, %c0_2] : memref<128x1xf32, #tpu.memory_space<vmem>>, vector<128x1xf32>
    %c0_3 = arith.constant 0 : index
    %c0_4 = arith.constant 0 : index
    %2 = vector.load %arg4[%c0_3, %c0_4] : memref<64x128xbf16, #tpu.memory_space<vmem>>, vector<64x128xbf16>
    %c0_5 = arith.constant 0 : index
    %c0_6 = arith.constant 0 : index
    %3 = vector.load %arg5[%c0_5, %c0_6] : memref<64x1xf32, #tpu.memory_space<vmem>>, vector<64x1xf32>
    %c1 = arith.constant 1 : index
    %c0_7 = arith.constant 0 : index
    %4 = vector.load %arg6[%c1, %c0_7] : memref<2x64xf32, #tpu.memory_space<vmem>>, vector<1x64xf32>
    %c0_8 = arith.constant 0 : index
    %c0_9 = arith.constant 0 : index
    %5 = vector.load %arg6[%c0_8, %c0_9] : memref<2x64xf32, #tpu.memory_space<vmem>>, vector<1x64xf32>
    %6 = arith.subf %4, %5 : vector<1x64xf32>
    %c1_10 = arith.constant 1 : index
    %c0_11 = arith.constant 0 : index
    %7 = vector.load %arg7[%c1_10, %c0_11] : memref<2x1xf32, #tpu.memory_space<vmem>>, vector<1x1xf32>
    %c0_12 = arith.constant 0 : index
    %c0_13 = arith.constant 0 : index
    %8 = vector.load %arg7[%c0_12, %c0_13] : memref<2x1xf32, #tpu.memory_space<vmem>>, vector<1x1xf32>
    %9 = arith.subf %7, %8 : vector<1x1xf32>
    %c0_i32 = arith.constant 0 : i32
    %c128_i32 = arith.constant 128 : i32
    %10 = arith.muli %c0_i32, %c128_i32 : i32
    %11 = tpu.assume_multiple %10, 128 : i32
    %c0_14 = arith.constant 0 : index
    %12 = arith.index_cast %11 : i32 to index
    %13 = vector.load %arg1[%c0_14, %12] : memref<4x128xf32, #tpu.memory_space<vmem>>, vector<4x128xf32>
    %14 = vector.extract_strided_slice %0 {offsets = [0, 0], sizes = [128, 1], strides = [1, 1]} : vector<128x4xf32> to vector<128x1xf32>
    %15 = vector.extract_strided_slice %13 {offsets = [0, 0], sizes = [1, 128], strides = [1, 1]} : vector<4x128xf32> to vector<1x128xf32>
    %16 = vector.broadcast %14 : vector<128x1xf32> to vector<128x128xf32>
    %17 = vector.broadcast %15 : vector<1x128xf32> to vector<128x128xf32>
    %18 = arith.mulf %16, %17 : vector<128x128xf32>
    %19 = vector.extract_strided_slice %0 {offsets = [0, 1], sizes = [128, 1], strides = [1, 1]} : vector<128x4xf32> to vector<128x1xf32>
    %20 = vector.extract_strided_slice %13 {offsets = [1, 0], sizes = [1, 128], strides = [1, 1]} : vector<4x128xf32> to vector<1x128xf32>
    %21 = vector.broadcast %19 : vector<128x1xf32> to vector<128x128xf32>
    %22 = vector.broadcast %20 : vector<1x128xf32> to vector<128x128xf32>
    %23 = arith.mulf %21, %22 : vector<128x128xf32>
    %24 = arith.addf %18, %23 : vector<128x128xf32>
    %25 = vector.extract_strided_slice %0 {offsets = [0, 2], sizes = [128, 1], strides = [1, 1]} : vector<128x4xf32> to vector<128x1xf32>
    %26 = vector.extract_strided_slice %13 {offsets = [2, 0], sizes = [1, 128], strides = [1, 1]} : vector<4x128xf32> to vector<1x128xf32>
    %27 = vector.broadcast %25 : vector<128x1xf32> to vector<128x128xf32>
    %28 = vector.broadcast %26 : vector<1x128xf32> to vector<128x128xf32>
    %29 = arith.mulf %27, %28 : vector<128x128xf32>
    %30 = arith.addf %24, %29 : vector<128x128xf32>
    %31 = vector.extract_strided_slice %0 {offsets = [0, 3], sizes = [128, 1], strides = [1, 1]} : vector<128x4xf32> to vector<128x1xf32>
    %32 = vector.extract_strided_slice %13 {offsets = [3, 0], sizes = [1, 128], strides = [1, 1]} : vector<4x128xf32> to vector<1x128xf32>
    %33 = vector.broadcast %31 : vector<128x1xf32> to vector<128x128xf32>
    %34 = vector.broadcast %32 : vector<1x128xf32> to vector<128x128xf32>
    %35 = arith.mulf %33, %34 : vector<128x128xf32>
    %36 = arith.addf %30, %35 : vector<128x128xf32>
    %37 = vector.broadcast %1 : vector<128x1xf32> to vector<128x128xf32>
    %38 = arith.addf %36, %37 : vector<128x128xf32>
    %cst = arith.constant 0.000000e+00 : f32
    %39 = vector.broadcast %cst : f32 to vector<128x128xf32>
    %40 = arith.maximumf %38, %39 : vector<128x128xf32>
    %41 = arith.truncf %40 : vector<128x128xf32> to vector<128x128xbf16>
    %cst_15 = arith.constant dense<0.000000e+00> : vector<64x128xf32>
    %42 = tpu.matmul %2, %41, %cst_15 {dimension_numbers = #tpu.dot_dimension_numbers<[1], [0], [0], [1], [0, 0, 1, 1], [], []>} : vector<64x128xbf16>, vector<128x128xbf16>, vector<64x128xf32> -> vector<64x128xf32>
    %43 = vector.broadcast %3 : vector<64x1xf32> to vector<64x128xf32>
    %44 = arith.addf %42, %43 : vector<64x128xf32>
    %cst_16 = arith.constant 0.000000e+00 : f32
    %45 = vector.broadcast %cst_16 : f32 to vector<64x128xf32>
    %46 = arith.maximumf %44, %45 : vector<64x128xf32>
    %cst_17 = arith.constant dense<0.000000e+00> : vector<1x128xf32>
    %47 = tpu.matmul %6, %46, %cst_17 {dimension_numbers = #tpu.dot_dimension_numbers<[1], [0], [0], [1], [0, 0, 1, 1], [], []>} : vector<1x64xf32>, vector<64x128xf32>, vector<1x128xf32> -> vector<1x128xf32>
    %48 = vector.broadcast %9 : vector<1x1xf32> to vector<1x128xf32>
    %49 = arith.addf %47, %48 : vector<1x128xf32>
    %cst_18 = arith.constant 0.000000e+00 : f32
    %50 = vector.broadcast %cst_18 : f32 to vector<1x128xf32>
    %51 = arith.subf %50, %49 : vector<1x128xf32>
    %52 = math.exp %51 : vector<1x128xf32>
    %cst_19 = arith.constant 1.000000e+00 : f32
    %53 = vector.broadcast %cst_19 : f32 to vector<1x128xf32>
    %54 = arith.addf %53, %52 : vector<1x128xf32>
    %cst_20 = arith.constant 1.000000e+00 : f32
    %55 = vector.broadcast %cst_20 : f32 to vector<1x128xf32>
    %56 = arith.divf %55, %54 : vector<1x128xf32>
    %cst_21 = arith.constant 1.000000e+00 : f32
    %57 = vector.broadcast %cst_21 : f32 to vector<1x128xf32>
    %58 = arith.subf %57, %56 : vector<1x128xf32>
    %59 = tpu.concatenate %58, %56 in 0 : vector<1x128xf32>, vector<1x128xf32> -> vector<2x128xf32>
    %c0_22 = arith.constant 0 : index
    %60 = arith.index_cast %11 : i32 to index
    %61 = vector.load %arg8[%c0_22, %60] : memref<2x128xf32, #tpu.memory_space<vmem>>, vector<2x128xf32>
    tpu.vector_store %arg8[%c0_22, %60], %59 {strides = array<i32>} : memref<2x128xf32, #tpu.memory_space<vmem>>, vector<2x128xf32>,
    %c1_i32 = arith.constant 1 : i32
    return
  }
  func.func @transform_0(%arg0: i32) -> (i32, i32) {
    %c0_i32 = arith.constant 0 : i32
    %c0_i32_0 = arith.constant 0 : i32
    return %c0_i32, %arg0 : i32, i32
  }
  func.func @transform_1(%arg0: i32) -> (i32, i32) {
    %c0_i32 = arith.constant 0 : i32
    %c0_i32_0 = arith.constant 0 : i32
    %c0_i32_1 = arith.constant 0 : i32
    return %c0_i32, %c0_i32_0 : i32, i32
  }
  func.func @transform_2(%arg0: i32) -> (i32, i32) {
    %c0_i32 = arith.constant 0 : i32
    %c0_i32_0 = arith.constant 0 : i32
    %c0_i32_1 = arith.constant 0 : i32
    return %c0_i32, %c0_i32_0 : i32, i32
  }
  func.func @transform_3(%arg0: i32) -> (i32, i32) {
    %c0_i32 = arith.constant 0 : i32
    %c0_i32_0 = arith.constant 0 : i32
    %c0_i32_1 = arith.constant 0 : i32
    return %c0_i32, %c0_i32_0 : i32, i32
  }
  func.func @transform_4(%arg0: i32) -> (i32, i32) {
    %c0_i32 = arith.constant 0 : i32
    %c0_i32_0 = arith.constant 0 : i32
    %c0_i32_1 = arith.constant 0 : i32
    return %c0_i32, %c0_i32_0 : i32, i32
  }
  func.func @transform_5(%arg0: i32) -> (i32, i32) {
    %c0_i32 = arith.constant 0 : i32
    %c0_i32_0 = arith.constant 0 : i32
    %c0_i32_1 = arith.constant 0 : i32
    return %c0_i32, %c0_i32_0 : i32, i32
  }
  func.func @transform_6(%arg0: i32) -> (i32, i32) {
    %c0_i32 = arith.constant 0 : i32
    %c0_i32_0 = arith.constant 0 : i32
    %c0_i32_1 = arith.constant 0 : i32
    return %c0_i32, %c0_i32_0 : i32, i32
  }
  func.func @transform_7(%arg0: i32) -> (i32, i32) {
    %c0_i32 = arith.constant 0 : i32
    %c0_i32_0 = arith.constant 0 : i32
    return %c0_i32, %arg0 : i32, i32
  }
}

</mosaic_0001>

<bundles_post_ra>
// kernel: tpu_custom_call.1
= control target key start
LH: loop header
LB: loop body
LE: loop exit
PB: predicated region body
PF: predicated region fallthrough
CT: control target
= control target key end

     0   :  { %v994_v2 = vmov 1   ;;  %v995_v6 = vmov 2   ;;  %s1446_s0 = inlined_call_operand.vmem [shape: f32[4,128], index: 0, kind: input, shape index: {}]   ;;  %s1447_s1 = inlined_call_operand.vmem [shape: f32[128,4], index: 1, kind: input, shape index: {}]   ;;  %s1448_s2 = inlined_call_operand.vmem [shape: f32[128,1], index: 2, kind: input, shape index: {}]   ;;  %s1449_s3 = inlined_call_operand.vmem [shape: bf16[64,128], index: 3, kind: input, shape index: {}]   ;;  %s1450_s4 = inlined_call_operand.vmem [shape: f32[64,1], index: 4, kind: input, shape index: {}]   ;;  %s1451_s5 = inlined_call_operand.vmem [shape: f32[2,64], index: 5, kind: input, shape index: {}]   ;;  %s1452_s6 = inlined_call_operand.vmem [shape: f32[2,1], index: 6, kind: input, shape index: {}]   ;;  %s1453_s7 = inlined_call_operand.hbm [shape: f32[2,128], index: 7, kind: output, shape index: {}]  }
   0x1   :  { %v1044_v0 = vld [vmem:[%s1447_s1 + $0x70] sm:$0xff]  ;;  %929 = vset.pattern.permute.xlu0 %v994_v2  ;;  %922 = vset.pattern.permute.xlu1 %v994_v2  ;;  %v43_v3 = vld [vmem:[%s1447_s1 + $0x78] sm:$0xff] }
   0x2   :  { %v38_v1 = vld [vmem:[%s1447_s1 + $0x50] sm:$0xff]  ;;  %240 = vperm.xlu1 %922, %v1044_v0  }
   0x3   :  { %224 = vperm.xlu0 %929, %v38_v1   ;;  %v1058_v4 = vld [vmem:[%s1447_s1 + $0x30] sm:$0xff] }
   0x4   :  { %v1064_v5 = vld [vmem:[%s1447_s1 + $0x10] sm:$0xff] }
   0x6   :  { %244 = vperm.xlu1 %922, %v43_v3  }
   0x7   :  { %208 = vperm.xlu0 %929, %v1058_v4  }
   0xa   :  { %923 = vset.pattern.permute.xlu1 %v995_v6 }
   0xb   :  { %192 = vperm.xlu0 %929, %v1064_v5  }
   0xc   :  { %12 = vsyncpa [#allocation3], 0  ;;  %344 = vperm.xlu1 %923, %v43_v3   ;;  %v40_v7 = vld [vmem:[%s1447_s1 + $0x60] sm:$0xff]  ;;  %v996_v8 = vmov 0   ;;  %v41_v9 = vld [vmem:[%s1447_s1 + $0x68] sm:$0xff]  ;;  %v997_v10 = vmov 3   ;;  %v163_v46 = vlaneseq }
   0xd   :  { %v39_v11 = vld [vmem:[%s1447_s1 + $0x58] sm:$0xff]  ;;  %v37_v12 = vld [vmem:[%s1447_s1 + $0x48] sm:$0xff]  ;;  %v58_v14 = vld [vmem:[%s1448_s2 + $0x70] sm:$0xff]  ;;  %vm999_vm0 = vmmov 0   ;;  %vm745_vm1 = vcmask 523264   ;;  %vm829_vm2 = vcmask 1040384  }
   0xe   :  { %v1097_v13 = vld [vmem:[%s1447_s1 + $0x28] sm:$0xff]  ;;  %v59_v15 = vld [vmem:[%s1448_s2 + $0x78] sm:$0xff]  ;;  %v1111_v16 = vld [vmem:[%s1447_s1] sm:$0xff]  ;;  %v164_v50 = vshrl.u32 %v163_v46, 7 }
   0xf   :  { %950 = vset.pattern.permute.xlu0 %v995_v6  ;;  %v36_v17 = vld [vmem:[%s1447_s1 + $0x40] sm:$0xff]  ;;  %v57_v18 = vld [vmem:[%s1448_s2 + $0x68] sm:$0xff]  ;;  %v35_v22 = vld [vmem:[%s1447_s1 + $0x38] sm:$0xff] }
  0x10   :  { %924 = vset.pattern.permute.xlu1 %v996_v8  ;;  %340 = vperm.xlu0 %950, %v1044_v0   ;;  %v56_v19 = vld [vmem:[%s1448_s2 + $0x60] sm:$0xff]  ;;  %v53_v20 = vld [vmem:[%s1448_s2 + $0x48] sm:$0xff]  ;;  %v47_v24 = vld [vmem:[%s1448_s2 + $0x18] sm:$0xff]  ;;  %v249_v53 = vsub.s32 1, %v164_v50  ;;  %v349_v55 = vsub.s32 2, %v164_v50  ;;  %v165_v56 = vsub.s32 0, %v164_v50 }
  0x11   :  { %145 = vperm.xlu1 %924, %v40_v7   ;;  %v1140_v21 = vld [vmem:[%s1447_s1 + $0x8] sm:$0xff]  ;;  %v75_v25 = vld [vmem:[%s1450_s4 + $0x38] sm:$0xff]  ;;  %v54_v26 = vld [vmem:[%s1448_s2 + $0x50] sm:$0xff]  ;;  %v449_v63 = vsub.s32 3, %v164_v50 }
  0x12   :  { %v49_v23 = vld [vmem:[%s1448_s2 + $0x28] sm:$0xff]  ;;  %v55_v28 = vld [vmem:[%s1448_s2 + $0x58] sm:$0xff]  ;;  %v79_v33 = vld [vmem:[%s1452_s6 + $0x1] sm:$0x1] }
  0x13   :  { %v73_v27 = vld [vmem:[%s1450_s4 + $0x28] sm:$0xff]  ;;  %v71_v29 = vld [vmem:[%s1450_s4 + $0x18] sm:$0xff]  ;;  %v80_v34 = vld [vmem:[%s1452_s6] sm:$0x1] }
  0x14   :  { %336 = vperm.xlu0 %950, %v41_v9   ;;  %v69_v32 = vld [vmem:[%s1450_s4 + $0x8] sm:$0xff]  ;;  %v81_v37 = vsub.f32 %v79_v33, %v80_v34  ;;  %v32_v38 = vld [vmem:[%s1447_s1 + $0x20] sm:$0xff] }
  0x15   :  { %925 = vset.pattern.permute.xlu1 %v994_v2  ;;  %v52_v49 = vld [vmem:[%s1448_s2 + $0x40] sm:$0xff] }
  0x16   :  { %232 = vperm.xlu1 %925, %v40_v7   ;;  %v82_v54 = vld [vmem:[%s1446_s0] sm:$0xf] }
  0x17   :  { %v1224_v59 = vrot.slane %v82_v54, %v249_v53  ;;  %v1227_v61 = vrot.slane %v82_v54, %v349_v55  ;;  %v1229_v62 = vrot.slane %v82_v54, %v165_v56 }
  0x18   :  { %324 = vperm.xlu0 %950, %v38_v1  }
  0x1a   :  { %236 = vperm.xlu1 %925, %v41_v9  }
  0x1c   :  { %308 = vperm.xlu0 %950, %v1058_v4  }
  0x1e   :  { %926 = vset.pattern.permute.xlu1 %v997_v10 }
  0x1f   :  { %444 = vperm.xlu1 %926, %v43_v3  }
  0x20   :  { %292 = vperm.xlu0 %950, %v1064_v5  }
  0x23   :  { %927 = vset.pattern.permute.xlu1 %v995_v6 }
  0x24   :  { %332 = vperm.xlu1 %927, %v40_v7   ;;  %954 = vset.pattern.permute.xlu0 %v997_v10 }
  0x25   :  { %440 = vperm.xlu0 %954, %v1044_v0  }
  0x28   :  { %928 = vset.pattern.permute.xlu1 %v996_v8 }
  0x29   :  { %135 = vperm.xlu1 %928, %v38_v1   ;;  %436 = vperm.xlu0 %954, %v41_v9  }
  0x2d   :  { %140 = vperm.xlu1 %928, %v39_v11   ;;  %424 = vperm.xlu0 %954, %v38_v1  }
  0x31   :  { %930 = vset.pattern.permute.xlu1 %v994_v2  ;;  %420 = vperm.xlu0 %954, %v37_v12  }
  0x32   :  { %228 = vperm.xlu1 %930, %v39_v11  }
  0x35   :  { %408 = vperm.xlu0 %954, %v1058_v4  }
  0x36   :  { %931 = vset.pattern.permute.xlu1 %v997_v10 }
  0x37   :  { %432 = vperm.xlu1 %931, %v40_v7   ;;  %v1241_v7 = vrot.slane %v82_v54, %v449_v63 }
  0x39   :  { %404 = vperm.xlu0 %954, %v1097_v13  }
  0x3b   :  { %932 = vset.pattern.permute.xlu1 %v996_v8 }
  0x3c   :  { %555 = vperm.xlu1 %932, %v58_v14  }
  0x3d   :  { %392 = vperm.xlu0 %954, %v1064_v5  }
  0x40   :  { %560 = vperm.xlu1 %932, %v59_v15  }
  0x41   :  { %384 = vperm.xlu0 %954, %v1111_v16  }
  0x44   :  { %933 = vset.pattern.permute.xlu1 %v995_v6 }
  0x45   :  { %328 = vperm.xlu1 %933, %v39_v11   ;;  %961 = vset.pattern.permute.xlu0 %v996_v8 }
  0x46   :  { %155 = vperm.xlu0 %961, %v1044_v0  }
  0x49   :  { %934 = vset.pattern.permute.xlu1 %v996_v8 }
  0x4a   :  { %125 = vperm.xlu1 %934, %v36_v17   ;;  %160 = vperm.xlu0 %961, %v43_v3  }
  0x4e   :  { %935 = vset.pattern.permute.xlu1 %v994_v2  ;;  %150 = vperm.xlu0 %961, %v41_v9  }
  0x4f   :  { %216 = vperm.xlu1 %935, %v36_v17  }
  0x52   :  { %130 = vperm.xlu0 %961, %v37_v12  }
  0x53   :  { %220 = vperm.xlu1 %935, %v37_v12  }
  0x56   :  { %550 = vperm.xlu0 %961, %v57_v18  }
  0x57   :  { %936 = vset.pattern.permute.xlu1 %v997_v10 }
  0x58   :  { %428 = vperm.xlu1 %936, %v39_v11  }
  0x5a   :  { %115 = vperm.xlu0 %961, %v1058_v4  }
  0x5c   :  { %937 = vset.pattern.permute.xlu1 %v996_v8 }
  0x5d   :  { %545 = vperm.xlu1 %937, %v56_v19  }
  0x5e   :  { %110 = vperm.xlu0 %961, %v1097_v13  }
  0x61   :  { %938 = vset.pattern.permute.xlu1 %v995_v6 }
  0x62   :  { %316 = vperm.xlu1 %938, %v36_v17   ;;  %530 = vperm.xlu0 %961, %v53_v20  }
  0x66   :  { %320 = vperm.xlu1 %938, %v37_v12   ;;  %95 = vperm.xlu0 %961, %v1064_v5   ;;  %v1239_v5 = vld [vmem:[%s1447_s1 + $0x18] sm:$0xff] }
  0x6a   :  { %939 = vset.pattern.permute.xlu1 %v996_v8  ;;  %90 = vperm.xlu0 %961, %v1140_v21  }
  0x6b   :  { %120 = vperm.xlu1 %939, %v35_v22  }
  0x6e   :  { %510 = vperm.xlu0 %961, %v49_v23   ;;  %v50_v23 = vld [vmem:[%s1448_s2 + $0x30] sm:$0xff] }
  0x6f   :  { %940 = vset.pattern.permute.xlu1 %v994_v2 }
  0x70   :  { %212 = vperm.xlu1 %940, %v35_v22  }
  0x72   :  { %500 = vperm.xlu0 %961, %v47_v24  }
  0x74   :  { %941 = vset.pattern.permute.xlu1 %v997_v10 }
  0x75   :  { %416 = vperm.xlu1 %941, %v36_v17  }
  0x76   :  { %640 = vperm.xlu0 %961, %v75_v25  }
  0x79   :  { %942 = vset.pattern.permute.xlu1 %v996_v8 }
  0x7a   :  { %535 = vperm.xlu1 %942, %v54_v26   ;;  %630 = vperm.xlu0 %961, %v73_v27   ;;  %v51_v26 = vld [vmem:[%s1448_s2 + $0x38] sm:$0xff] }
  0x7d   :  { %v1171_v30 = vpop.permute.xlu1 %240 }
  0x7e   :  { %540 = vperm.xlu1 %942, %v55_v28   ;;  %v225_v31 = vpop.permute.xlu0 %224  ;;  %620 = vperm.xlu0 %961, %v71_v29  }
  0x7f   :  { %v261_v60 = vmul.f32 %v1224_v59, %v225_v31 }
  0x81   :  { %v1182_v35 = vpop.permute.xlu1 %244 }
  0x82   :  { %943 = vset.pattern.permute.xlu1 %v995_v6  ;;  %v1185_v36 = vpop.permute.xlu0 %208  ;;  %610 = vperm.xlu0 %961, %v69_v32   ;;  %v265_v32 = vmul.f32 %v1224_v59, %v1171_v30 }
  0x83   :  { %312 = vperm.xlu1 %943, %v35_v22  }
  0x86   :  { %v1190_v39 = vpop.permute.xlu0 %192  ;;  %742 = vperm.xlu0 %961, %v81_v37  }
  0x87   :  { %v1192_v40 = vpop.permute.xlu1 %344  ;;  %944 = vset.pattern.permute.xlu1 %v996_v8 }
  0x88   :  { %105 = vperm.xlu1 %944, %v32_v38   ;;  %v366_v30 = vmul.f32 %v1227_v61, %v1192_v40 }
  0x8b   :  { %v1195_v41 = vpop.permute.xlu0 %340 }
  0x8c   :  { %v1197_v42 = vpop.permute.xlu1 %145  ;;  %945 = vset.pattern.permute.xlu1 %v994_v2  ;;  %v365_v33 = vmul.f32 %v1227_v61, %v1195_v41 }
  0x8d   :  { %200 = vperm.xlu1 %945, %v32_v38  }
  0x8f   :  { %v1200_v43 = vpop.permute.xlu0 %336 }
  0x91   :  { %v1202_v44 = vpop.permute.xlu1 %232  ;;  %204 = vperm.xlu1 %945, %v1097_v13  }
  0x93   :  { %v325_v45 = vpop.permute.xlu0 %324 }
  0x94   :  { %v361_v3 = vmul.f32 %v1227_v61, %v325_v45 }
  0x95   :  { %v1205_v47 = vpop.permute.xlu1 %236  ;;  %946 = vset.pattern.permute.xlu1 %v997_v10 }
  0x96   :  { %412 = vperm.xlu1 %946, %v35_v22   ;;  %v264_v56 = vmul.f32 %v1224_v59, %v1205_v47 }
  0x97   :  { %v1208_v48 = vpop.permute.xlu0 %308 }
  0x9a   :  { %v1213_v51 = vpop.permute.xlu1 %444  ;;  %947 = vset.pattern.permute.xlu1 %v996_v8 }
  0x9b   :  { %525 = vperm.xlu1 %947, %v52_v49   ;;  %v1216_v52 = vpop.permute.xlu0 %292  ;;  %v266_v49 = vmul.f32 %v1224_v59, %v1182_v35 }
  0x9f   :  { %v1221_v57 = vpop.permute.xlu1 %332  ;;  %948 = vset.pattern.permute.xlu1 %v995_v6 }
  0xa0   :  { %300 = vperm.xlu1 %948, %v32_v38   ;;  %v441_v58 = vpop.permute.xlu0 %440 }
  0xa1   :  { %v465_v37 = vmul.f32 %v1241_v7, %v441_v58  ;;  %v466_v58 = vmul.f32 %v1241_v7, %v1213_v51 }
  0xa4   :  { %v136_v0 = vpop.permute.xlu1 %135  ;;  %304 = vperm.xlu1 %948, %v1097_v13   ;;  %v1232_v1 = vpop.permute.xlu0 %436 }
  0xa5   :  { %v177_v4 = vmul.f32 %v1229_v62, %v136_v0  ;;  %v364_v0 = vmul.f32 %v1227_v61, %v1200_v43  ;;  %v464_v43 = vmul.f32 %v1241_v7, %v1232_v1  ;;  %v257_v1 = vmul.f32 %v1224_v59, %v1185_v36 }
  0xa7   :  { %v277_v9 = vadd.f32 %v261_v60, %v177_v4 }
  0xa8   :  { %v1243_v11 = vpop.permute.xlu1 %140  ;;  %949 = vset.pattern.permute.xlu1 %v996_v8  ;;  %v425_v12 = vpop.permute.xlu0 %424 }
  0xa9   :  { %v461_v13 = vmul.f32 %v1241_v7, %v425_v12  ;;  %100 = vperm.xlu1 %949, %v1239_v5   ;;  %v377_v14 = vadd.f32 %v361_v3, %v277_v9 }
  0xab   :  { %v1248_v15 = vadd.f32 %v461_v13, %v377_v14 }
  0xac   :  { %v1250_v17 = vpop.permute.xlu0 %420 }
  0xad   :  { %v1252_v18 = vpop.permute.xlu1 %228  ;;  %951 = vset.pattern.permute.xlu1 %v994_v2 }
  0xae   :  { %196 = vperm.xlu1 %951, %v1239_v5  }
  0xb0   :  { %v1256_v19 = vpop.permute.xlu0 %408 }
  0xb1   :  { %v457_v36 = vmul.f32 %v1241_v7, %v1256_v19  ;;  %v253_v19 = vmul.f32 %v1224_v59, %v1190_v39 }
  0xb2   :  { %v433_v20 = vpop.permute.xlu1 %432  ;;  %952 = vset.pattern.permute.xlu1 %v997_v10 }
  0xb3   :  { %400 = vperm.xlu1 %952, %v32_v38  }
  0xb4   :  { %v1259_v22 = vpop.permute.xlu0 %404 }
  0xb7   :  { %v556_v24 = vpop.permute.xlu1 %555  ;;  %953 = vset.pattern.permute.xlu1 %v996_v8 }
  0xb8   :  { %515 = vperm.xlu1 %953, %v50_v23   ;;  %v1265_v25 = vpop.permute.xlu0 %392 }
  0xbb   :  { %v561_v27 = vpop.permute.xlu1 %560 }
  0xbc   :  { %520 = vperm.xlu1 %953, %v51_v26   ;;  %v1270_v28 = vpop.permute.xlu0 %384 }
  0xc0   :  { %v1272_v29 = vpop.permute.xlu1 %328  ;;  %955 = vset.pattern.permute.xlu1 %v995_v6 }
  0xc1   :  { %296 = vperm.xlu1 %955, %v1239_v5   ;;  %v156_v31 = vpop.permute.xlu0 %155 }
  0xc2   :  { %v181_v34 = vmul.f32 %v1229_v62, %v156_v31 }
  0xc4   :  { %v281_v38 = vadd.f32 %v265_v32, %v181_v34  ;;  %v363_v32 = vmul.f32 %v1227_v61, %v1221_v57  ;;  %v357_v57 = vmul.f32 %v1227_v61, %v1208_v48 }
  0xc5   :  { %v126_v45 = vpop.permute.xlu1 %125  ;;  %956 = vset.pattern.permute.xlu1 %v996_v8  ;;  %v161_v46 = vpop.permute.xlu0 %160 }
  0xc6   :  { %v381_v50 = vadd.f32 %v365_v33, %v281_v38  ;;  %v182_v53 = vmul.f32 %v1229_v62, %v161_v46  ;;  %85 = vperm.xlu1 %956, %v1111_v16   ;;  %v175_v40 = vmul.f32 %v1229_v62, %v126_v45 }
  0xc8   :  { %v282_v41 = vadd.f32 %v266_v49, %v182_v53  ;;  %v481_v54 = vadd.f32 %v465_v37, %v381_v50  ;;  %v463_v37 = vmul.f32 %v1241_v7, %v433_v20  ;;  %v48_v20 = vld [vmem:[%s1448_s2 + $0x20] sm:$0xff] }
  0xc9   :  { %v151_v55 = vpop.permute.xlu0 %150 }
  0xca   :  { %v382_v60 = vadd.f32 %v366_v30, %v282_v41  ;;  %v180_v35 = vmul.f32 %v1229_v62, %v151_v55  ;;  %v217_v63 = vpop.permute.xlu1 %216  ;;  %957 = vset.pattern.permute.xlu1 %v994_v2  ;;  %v577_v9 = vadd.f32 %v556_v24, %v481_v54  ;;  %v263_v2 = vmul.f32 %v1224_v59, %v1202_v44 }
  0xcb   :  { %v259_v3 = vmul.f32 %v1224_v59, %v217_v63  ;;  %184 = vperm.xlu1 %957, %v1111_v16   ;;  %v179_v24 = vmul.f32 %v1229_v62, %v1197_v42 }
  0xcc   :  { %v280_v4 = vadd.f32 %v264_v56, %v180_v35  ;;  %v482_v47 = vadd.f32 %v466_v58, %v382_v60  ;;  %v593_v26 = vmax.f32 %v577_v9, 0.0 }
  0xcd   :  { %v1300_v12 = vadd.f32 %v259_v3, %v175_v40  ;;  %v1302_v51 = vpop.permute.xlu0 %130  ;;  %v353_v40 = vmul.f32 %v1227_v61, %v1216_v52  ;;  %v46_v52 = vld [vmem:[%s1448_s2 + $0x10] sm:$0xff] }
  0xce   :  { %v1304_v13 = vpop.permute.xlu1 %220  ;;  %v578_v14 = vadd.f32 %v561_v27, %v482_v47  ;;  %v380_v23 = vadd.f32 %v364_v0, %v280_v4  ;;  %v279_v27 = vadd.f32 %v263_v2, %v179_v24 }
  0xcf   :  { %188 = vperm.xlu1 %957, %v1140_v21  }
  0xd0   :  { %v594_v31 = vmax.f32 %v578_v14, 0.0  ;;  %v480_v44 = vadd.f32 %v464_v43, %v380_v23  ;;  %v379_v45 = vadd.f32 %v363_v32, %v279_v27  ;;  %v178_v23 = vmul.f32 %v1229_v62, %v1243_v11 }
  0xd1   :  { %v551_v33 = vpop.permute.xlu0 %550 }
  0xd2   :  { %v602_v34 = vpack.c.bf16 %v594_v31, %v593_v26  ;;  %v576_v49 = vadd.f32 %v551_v33, %v480_v44  ;;  %v479_v50 = vadd.f32 %v463_v37, %v379_v45  ;;  %v362_v26 = vmul.f32 %v1227_v61, %v1272_v29  ;;  %v72_v29 = vld [vmem:[%s1450_s4 + $0x20] sm:$0xff]  ;;  %v70_v45 = vld [vmem:[%s1450_s4 + $0x10] sm:$0xff] }
  0xd3   :  { %v429_v38 = vpop.permute.xlu1 %428  ;;  %958 = vset.pattern.permute.xlu1 %v997_v10 }
  0xd4   :  { %872 = vmatprep.subr.bf16.mxu0 %v602_v34  ;;  %396 = vperm.xlu1 %958, %v1239_v5   ;;  %v592_v54 = vmax.f32 %v576_v49, 0.0  ;;  %v462_v24 = vmul.f32 %v1241_v7, %v429_v38  ;;  %v260_v49 = vmul.f32 %v1224_v59, %v1304_v13 }
  0xd5   :  { %873 = vmatpush3.bf16.msra.mxu0 %v602_v34  ;;  %v116_v42 = vpop.permute.xlu0 %115  ;;  %v964_v34 = vld [vmem:[%s1449_s3] sm:$0xff]  }
  0xd6   :  { %v173_v46 = vmul.f32 %v1229_v62, %v116_v42  ;;  %888 = vmatprep.mubr.bf16.mxu0 %v964_v34 }
  0xd8   :  { %v546_v53 = vpop.permute.xlu1 %545  ;;  %959 = vset.pattern.permute.xlu1 %v996_v8  ;;  %v273_v5 = vadd.f32 %v257_v1, %v173_v46  ;;  %v176_v46 = vmul.f32 %v1229_v62, %v1302_v51 }
  0xd9   :  { %v575_v30 = vadd.f32 %v546_v53, %v479_v50  ;;  %505 = vperm.xlu1 %959, %v48_v20   ;;  %v1329_v41 = vpop.permute.xlu0 %110 }
  0xda   :  { %v373_v48 = vadd.f32 %v357_v57, %v273_v5  ;;  %v172_v34 = vmul.f32 %v1229_v62, %v1329_v41 }
  0xdb   :  { %v591_v55 = vmax.f32 %v575_v30, 0.0  ;;  %v276_v30 = vadd.f32 %v260_v49, %v176_v46 }
  0xdc   :  { %v1331_v56 = vadd.f32 %v457_v36, %v373_v48 }
  0xdd   :  { %v601_v58 = vpack.c.bf16 %v592_v54, %v591_v55  ;;  %v1333_v60 = vpop.permute.xlu1 %316  ;;  %960 = vset.pattern.permute.xlu1 %v995_v6  ;;  %v1336_v35 = vpop.permute.xlu0 %530  ;;  %v453_v6 = vmul.f32 %v1241_v7, %v1265_v25  ;;  %v460_v55 = vmul.f32 %v1241_v7, %v1250_v17 }
  0xde   :  { %284 = vperm.xlu1 %960, %v1111_v16   ;;  %v359_v51 = vmul.f32 %v1227_v61, %v1333_v60 }
  0xdf   :  { %874 = vmatprep.subr.bf16.mxu0 %v601_v58 }
  0xe0   :  { %875 = vmatpush3.bf16.msra.mxu0 %v601_v58 }
  0xe1   :  { %v321_v63 = vpop.permute.xlu1 %320  ;;  %v96_v0 = vpop.permute.xlu0 %95 }
  0xe2   :  { %288 = vperm.xlu1 %960, %v1140_v21   ;;  %v169_v3 = vmul.f32 %v1229_v62, %v96_v0  ;;  %v360_v36 = vmul.f32 %v1227_v61, %v321_v63  ;;  %v375_v63 = vadd.f32 %v359_v51, %v1300_v12 }
  0xe4   :  { %v269_v4 = vadd.f32 %v253_v19, %v169_v3  ;;  %v376_v58 = vadd.f32 %v360_v36, %v276_v30 }
  0xe6   :  { %v121_v47 = vpop.permute.xlu1 %120  ;;  %962 = vset.pattern.permute.xlu1 %v997_v10  ;;  %v369_v16 = vadd.f32 %v353_v40, %v269_v4  ;;  %v44_v10 = vld [vmem:[%s1448_s2] sm:$0xff]  ;;  %v476_v19 = vadd.f32 %v460_v55, %v376_v58 }
  0xe7   :  { %388 = vperm.xlu1 %962, %v1140_v21   ;;  %v174_v14 = vmul.f32 %v1229_v62, %v121_v47  ;;  %v262_v21 = vmul.f32 %v1224_v59, %v1252_v18  ;;  %v74_v18 = vld [vmem:[%s1450_s4 + $0x30] sm:$0xff] }
  0xe8   :  { %v1349_v39 = vadd.f32 %v453_v6, %v369_v16  ;;  %v572_v40 = vadd.f32 %v1336_v35, %v476_v19 }
  0xe9   :  { %v278_v31 = vadd.f32 %v262_v21, %v178_v23 }
  0xea   :  { %v588_v47 = vmax.f32 %v572_v40, 0.0 }
  0xeb   :  { %v213_v9 = vpop.permute.xlu1 %212  ;;  %963 = vset.pattern.permute.xlu1 %v996_v8  ;;  %v45_v8 = vld [vmem:[%s1448_s2 + $0x8] sm:$0xff]  ;;  %v378_v33 = vadd.f32 %v362_v26, %v278_v31 }
  0xec   :  { %v258_v25 = vmul.f32 %v1224_v59, %v213_v9  ;;  %495 = vperm.xlu1 %963, %v46_v52  }
  0xed   :  { %v478_v11 = vadd.f32 %v462_v24, %v378_v33 }
  0xee   :  { %v1360_v2 = vadd.f32 %v258_v25, %v174_v14 }
  0xf0   :  { %v417_v43 = vpop.permute.xlu1 %416  ;;  %485 = vperm.xlu1 %963, %v44_v10  }
  0xf1   :  { %v459_v13 = vmul.f32 %v1241_v7, %v417_v43 }
  0xf3   :  { %v475_v3 = vadd.f32 %v459_v13, %v375_v63 }
  0xf4   :  { %490 = vperm.xlu1 %963, %v45_v8  }
  0xf5   :  { %v536_v32 = vpop.permute.xlu1 %535 }
  0xf6   :  { %v573_v27 = vadd.f32 %v536_v32, %v1248_v15  ;;  %v68_v15 = vld [vmem:[%s1450_s4] sm:$0xff] }
  0xf8   :  { %635 = vperm.xlu1 %963, %v74_v18   ;;  %v589_v38 = vmax.f32 %v573_v27, 0.0 }
  0xf9   :  { %v541_v37 = vpop.permute.xlu1 %540 }
  0xfa   :  { %v574_v44 = vadd.f32 %v541_v37, %v478_v11 }
  0xfc   :  { %v590_v1 = vmax.f32 %v574_v44, 0.0  ;;  %625 = vperm.xlu1 %963, %v72_v29  }
  0xfe   :  { %v600_v42 = vpack.c.bf16 %v590_v1, %v589_v38  ;;  %v313_v57 = vpop.permute.xlu1 %312  ;;  %v456_v38 = vmul.f32 %v1241_v7, %v1259_v22 }
  0xff   :  { %v358_v10 = vmul.f32 %v1227_v61, %v313_v57 }
 0x100   :  { %876 = vmatprep.subr.bf16.mxu0 %v600_v42  ;;  %615 = vperm.xlu1 %963, %v70_v45  }
 0x101   :  { %877 = vmatpush3.bf16.msra.mxu0 %v600_v42  ;;  %v374_v35 = vadd.f32 %v358_v10, %v1360_v2 }
 0x103   :  { %v106_v20 = vpop.permute.xlu1 %105 }
 0x104   :  { %605 = vperm.xlu1 %963, %v68_v15   ;;  %v171_v53 = vmul.f32 %v1229_v62, %v106_v20 }
 0x108   :  { %v201_v50 = vpop.permute.xlu1 %200 }
 0x109   :  { %v255_v5 = vmul.f32 %v1224_v59, %v201_v50 }
 0x10b   :  { %v271_v48 = vadd.f32 %v255_v5, %v171_v53 }
 0x10c   :  { %v205_v54 = vpop.permute.xlu1 %204 }
 0x10d   :  { %v256_v27 = vmul.f32 %v1224_v59, %v205_v54 }
 0x10f   :  { %v272_v37 = vadd.f32 %v256_v27, %v172_v34 }
 0x111   :  { %v413_v0 = vpop.permute.xlu1 %412 }
 0x112   :  { %v458_v21 = vmul.f32 %v1241_v7, %v413_v0 }
 0x114   :  { %v474_v8 = vadd.f32 %v458_v21, %v374_v35 }
 0x116   :  { %v526_v6 = vpop.permute.xlu1 %525 }
 0x117   :  { %v571_v4 = vadd.f32 %v526_v6, %v475_v3 }
 0x119   :  { %v587_v16 = vmax.f32 %v571_v4, 0.0 }
 0x11b   :  { %v599_v52 = vpack.c.bf16 %v588_v47, %v587_v16  ;;  %v301_v9 = vpop.permute.xlu1 %300 }
 0x11c   :  { %v355_v1 = vmul.f32 %v1227_v61, %v301_v9 }
 0x11d   :  { %878 = vmatprep.subr.bf16.mxu0 %v599_v52 }
 0x11e   :  { %879 = vmatpush3.bf16.msra.mxu0 %v599_v52  ;;  %v371_v41 = vadd.f32 %v355_v1, %v271_v48 }
 0x11f   :  { %v305_v17 = vpop.permute.xlu1 %304 }
 0x120   :  { %v356_v2 = vmul.f32 %v1227_v61, %v305_v17 }
 0x122   :  { %v372_v44 = vadd.f32 %v356_v2, %v272_v37 }
 0x124   :  { %v101_v14 = vpop.permute.xlu1 %100  ;;  %v472_v45 = vadd.f32 %v456_v38, %v372_v44 }
 0x125   :  { %v170_v22 = vmul.f32 %v1229_v62, %v101_v14 }
 0x129   :  { %v197_v60 = vpop.permute.xlu1 %196 }
 0x12a   :  { %v254_v54 = vmul.f32 %v1224_v59, %v197_v60 }
 0x12c   :  { %v270_v51 = vadd.f32 %v254_v54, %v170_v22 }
 0x12e   :  { %v401_v25 = vpop.permute.xlu1 %400 }
 0x12f   :  { %v455_v42 = vmul.f32 %v1241_v7, %v401_v25  ;;  %v451_v25 = vmul.f32 %v1241_v7, %v1270_v28  ;;  %v966_v28 = vld [vmem:[%s1449_s3 + $0x10] sm:$0xff]  }
 0x131   :  { %v471_v46 = vadd.f32 %v455_v42, %v371_v41 }
 0x133   :  { %v516_v12 = vpop.permute.xlu1 %515 }
 0x134   :  { %v569_v43 = vadd.f32 %v516_v12, %v1331_v56  ;;  %v91_v56 = vpop.permute.xlu0 %90 }
 0x135   :  { %v168_v9 = vmul.f32 %v1229_v62, %v91_v56 }
 0x136   :  { %v585_v31 = vmax.f32 %v569_v43, 0.0 }
 0x137   :  { %v521_v23 = vpop.permute.xlu1 %520 }
 0x138   :  { %v570_v26 = vadd.f32 %v521_v23, %v474_v8  ;;  %v511_v15 = vpop.permute.xlu0 %510 }
 0x139   :  { %v568_v20 = vadd.f32 %v511_v15, %v472_v45 }
 0x13a   :  { %v586_v24 = vmax.f32 %v570_v26, 0.0 }
 0x13b   :  { %v584_v36 = vmax.f32 %v568_v20, 0.0 }
 0x13c   :  { %v598_v32 = vpack.c.bf16 %v586_v24, %v585_v31  ;;  %v297_v18 = vpop.permute.xlu1 %296  ;;  %v501_v6 = vpop.permute.xlu0 %500 }
 0x13d   :  { %v354_v55 = vmul.f32 %v1227_v61, %v297_v18  ;;  %v967_v18 = vld [vmem:[%s1449_s3 + $0x18] sm:$0xff]  }
 0x13e   :  { %880 = vmatprep.subr.bf16.mxu0 %v598_v32 }
 0x13f   :  { %881 = vmatpush3.bf16.msra.mxu0 %v598_v32  ;;  %v370_v19 = vadd.f32 %v354_v55, %v270_v51 }
 0x141   :  { %v86_v33 = vpop.permute.xlu1 %85 }
 0x142   :  { %v167_v40 = vmul.f32 %v1229_v62, %v86_v33  ;;  %v998_v33 = vmov 0.0  }
 0x143   :  { %896 = vmatprep.subr.mxu1 %v998_v33  ;;  %912 = vmatprep.mubr.msk.f32.mxu1 %vm999_vm0, %v998_v33 }
 0x146   :  { %v185_v11 = vpop.permute.xlu1 %184 }
 0x147   :  { %v251_v13 = vmul.f32 %v1224_v59, %v185_v11  ;;  %v641_v11 = vpop.permute.xlu0 %640 }
 0x149   :  { %v267_v4 = vadd.f32 %v251_v13, %v167_v40  ;;  %v76_v13 = vld [vmem:[%s1451_s5 + $0x1] sm:$0x1] }
 0x14a   :  { %v189_v29 = vpop.permute.xlu1 %188 }
 0x14b   :  { %v252_v47 = vmul.f32 %v1224_v59, %v189_v29  ;;  %v631_v44 = vpop.permute.xlu0 %630 }
 0x14d   :  { %v268_v10 = vadd.f32 %v252_v47, %v168_v9 }
 0x14f   :  { %v397_v57 = vpop.permute.xlu1 %396 }
 0x150   :  { %v454_v48 = vmul.f32 %v1241_v7, %v397_v57 }
 0x152   :  { %v470_v0 = vadd.f32 %v454_v48, %v370_v19 }
 0x154   :  { %v506_v49 = vpop.permute.xlu1 %505  ;;  %v566_v16 = vadd.f32 %v501_v6, %v470_v0  ;;  %v77_v0 = vld [vmem:[%s1451_s5] sm:$0x1]  ;;  %s1000_s5 = smov [#allocation2]  }
 0x155   :  { %v567_v50 = vadd.f32 %v506_v49, %v471_v46  ;;  %v621_v46 = vpop.permute.xlu0 %620  ;;  %v78_v40 = vsub.f32 %v76_v13, %v77_v0  ;;  %s838_s21 = sshll.u32 %s1000_s5, 4  ;;  %s839_s21 = int_to_ptr.vmem [resolvable:$true] %s838_s21 }
 0x156   :  { %v582_v12 = vmax.f32 %v566_v16, 0.0  ;;  %s972_s22 = scalar_lea.vmem %s839_s21, 32  ;;  %p977_p1 = scmp.lt.s32.totalorder %s839_s21, %s839_s21 }
 0x157   :  { %v583_v53 = vmax.f32 %v567_v50, 0.0  ;;  %p973_p0 = scmp.ne.s32.totalorder %s839_s21, %s972_s22  ;;  %p978_p2 = scmp.lt.s32.totalorder %s972_s22, %s972_s22 }
 0x159   :  { %v597_v5 = vpack.c.bf16 %v584_v36, %v583_v53  ;;  %v285_v30 = vpop.permute.xlu1 %284  ;;  %v611_v22 = vpop.permute.xlu0 %610  ;;  %p979_p3 = por %p978_p2, %p977_p1 }
 0x15a   :  { %v351_v3 = vmul.f32 %v1227_v61, %v285_v30 }
 0x15b   :  { %882 = vmatprep.subr.bf16.mxu0 %v597_v5  ;;  %p980_p4 = pnand %p979_p3, %p973_p0 }
 0x15c   :  { %883 = vmatpush3.bf16.msra.mxu0 %v597_v5  ;;  %v367_v17 = vadd.f32 %v351_v3, %v267_v4 }
 0x15d   :  { %v289_v58 = vpop.permute.xlu1 %288  ;;  %v743_v6 = vpop.permute.xlu0 %742 }
 0x15e   :  { %v352_v14 = vmul.f32 %v1227_v61, %v289_v58  ;;  %v467_v23 = vadd.f32 %v451_v25, %v367_v17 }
 0x160   :  { %v368_v8 = vadd.f32 %v352_v14, %v268_v10 }
 0x162   :  { %v389_v63 = vpop.permute.xlu1 %388 }
 0x163   :  { %v452_v21 = vmul.f32 %v1241_v7, %v389_v63  ;;  %v965_v7 = vld [vmem:[%s1449_s3 + $0x8] sm:$0xff]  }
 0x165   :  { %v468_v62 = vadd.f32 %v452_v21, %v368_v8 }
 0x167   :  { %v496_v52 = vpop.permute.xlu1 %495 }
 0x168   :  { %v565_v60 = vadd.f32 %v496_v52, %v1349_v39 }
 0x16a   :  { %v581_v35 = vmax.f32 %v565_v60, 0.0 }
 0x16b   :  { %v486_v43 = vpop.permute.xlu1 %485 }
 0x16c   :  { %v596_v59 = vpack.c.bf16 %v582_v12, %v581_v35  ;;  %v563_v26 = vadd.f32 %v486_v43, %v467_v23 }
 0x16e   :  { %884 = vmatprep.subr.bf16.mxu0 %v596_v59  ;;  %v579_v24 = vmax.f32 %v563_v26, 0.0 }
 0x16f   :  { %885 = vmatpush3.bf16.msra.mxu0 %v596_v59  ;;  %v491_v31 = vpop.permute.xlu1 %490 }
 0x170   :  { %v564_v61 = vadd.f32 %v491_v31, %v468_v62 }
 0x172   :  { %v580_v39 = vmax.f32 %v564_v61, 0.0 }
 0x173   :  { %v636_v37 = vpop.permute.xlu1 %635 }
 0x174   :  { %v595_v32 = vpack.c.bf16 %v580_v39, %v579_v24 }
 0x176   :  { %886 = vmatprep.subr.bf16.mxu0 %v595_v32 }
 0x177   :  { %887 = vmatpush3.bf16.msra.mxu0 %v595_v32  ;;  %v626_v1 = vpop.permute.xlu1 %625 }
 0x17a   :  { %889 = vmatmul.mubr.bf16.vlgmr.msra.gmra.mxu0 %v965_v7 }
 0x17b   :  { %892 = vmatprep.mubr.bf16.mxu0 %v966_v28  ;;  %v616_v36 = vpop.permute.xlu1 %615 }
 0x17f   :  { %v606_v51 = vpop.permute.xlu1 %605 }
 0x182   :  { %893 = vmatmul.mubr.bf16.gmra.mxu0 %v967_v18 }
 0x23a   :  { %v890_v34 = vpop.f32.mrf.mxu0 }
 0x23b   :  { %v710_v30 = vadd.f32 %v890_v34, %v616_v36 }
 0x23c   :  { %v701_v27 = vpop.f32.mrf.mxu0 }
 0x23d   :  { %v734_v48 = vmax.f32 %v710_v30, 0.0  ;;  %v702_v19 = vadd.f32 %v701_v27, %v606_v51 }
 0x23e   :  { %v891_v2 = vpop.f32.mrf.mxu0 }
 0x23f   :  { %v713_v53 = vadd.f32 %v891_v2, %v621_v46  ;;  %v732_v3 = vmax.f32 %v702_v19, 0.0 }
 0x240   :  { %v704_v56 = vpop.f32.mrf.mxu0 }
 0x241   :  { %v735_v55 = vmax.f32 %v713_v53, 0.0  ;;  %v705_v58 = vadd.f32 %v704_v56, %v611_v22 }
 0x242   :  { %v894_v29 = vpop.f32.mrf.mxu0 }
 0x243   :  { %v726_v42 = vadd.f32 %v894_v29, %v636_v37  ;;  %v733_v63 = vmax.f32 %v705_v58, 0.0 }
 0x244   :  { %v717_v38 = vpop.f32.mrf.mxu0 }
 0x245   :  { %v738_v49 = vmax.f32 %v726_v42, 0.0  ;;  %v718_v50 = vadd.f32 %v717_v38, %v626_v1 }
 0x246   :  { %v895_v45 = vpop.f32.mrf.mxu0 }
 0x247   :  { %v729_v57 = vadd.f32 %v895_v45, %v641_v11  ;;  %v736_v54 = vmax.f32 %v718_v50, 0.0 }
 0x248   :  { %v720_v15 = vpop.f32.mrf.mxu0 }
 0x249   :  { %v739_v41 = vmax.f32 %v729_v57, 0.0  ;;  %v721_v20 = vadd.f32 %v720_v15, %v631_v44 }
 0x24b   :  { %897 = vmatpush3.msra.mxu1 %v739_v41  ;;  %v737_v5 = vmax.f32 %v721_v20, 0.0 }
 0x24c   :  { %898 = vmatprep.subr.mxu1 %v998_v33 }
 0x24d   :  { %899 = vmatpush3.msra.mxu1 %v738_v49 }
 0x24e   :  { %900 = vmatprep.subr.mxu1 %v998_v33 }
 0x24f   :  { %901 = vmatpush3.msra.mxu1 %v737_v5 }
 0x250   :  { %902 = vmatprep.subr.mxu1 %v998_v33 }
 0x251   :  { %903 = vmatpush3.msra.mxu1 %v736_v54 }
 0x252   :  { %904 = vmatprep.subr.mxu1 %v998_v33 }
 0x253   :  { %905 = vmatpush3.msra.mxu1 %v735_v55 }
 0x254   :  { %906 = vmatprep.subr.mxu1 %v998_v33 }
 0x255   :  { %907 = vmatpush3.msra.mxu1 %v734_v48 }
 0x256   :  { %908 = vmatprep.subr.mxu1 %v998_v33 }
 0x257   :  { %909 = vmatpush3.msra.mxu1 %v733_v63 }
 0x258   :  { %910 = vmatprep.subr.mxu1 %v998_v33 }
 0x259   :  { %911 = vmatpush3.msra.mxu1 %v732_v3 }
 0x25a   :  { %913 = vmatmul.mubr.msk.f32.vlgmr.msra.gmra.mxu1 %vm745_vm1, %v78_v40 }
 0x31a   :  { %v815_v4 = vpop.f32.mrf.mxu1 }
 0x31b   :  { %v816_v47 = vadd.f32 %v815_v4, %v743_v6 }
 0x31c   :  { %v914_v16 = vpop.f32.mrf.mxu1 }
 0x31d   :  { %v819_v52 = vsub.f32 0.0, %v816_v47 }
 0x31f   :  { %v820_v9 = vmul.f32 1.442695, %v819_v52 }
 0x321   :  { %968 = vpow2.f32 %v820_v9 }
 0x32e   :  { %v969_v17 = vpop.eup %968 }
 0x32f   :  { %v822_v14 = vadd.f32 1.0, %v969_v17 }
 0x331   :  { %970 = vrcp.f32 %v822_v14 }
 0x33e   :  { %v971_v60 = vpop.eup %970 }
 0x33f   :  { %v825_v25 = vsub.f32 1.0, %v971_v60  ;;  %v827_v10 = vrot.slane %v971_v60, 7 }
 0x341   :  { %v830_v21 = vsel %vm829_vm2, %v825_v25, %v827_v10 }
 0x342   :  { %831 = vst [vmem:[#allocation2] sm:$0x3] %v830_v21 }
 0x343   :  { %983 = shalt.err (!%p980_p4)
}
 0x344   :  { %841 = dma.vmem_to_hbm [thread:$0]  %s839_s21, 32, %s1453_s7, [#allocation3]  }
 0x345   :  { %992 = dma.done.wait [#allocation3], 32  }
 0x346   :  { %993 = vsyncadd [#allocation3], 4294967264 }
 0x347   :  { %845 = vsyncpa [#allocation3], 1 }

</bundles_post_ra>
